<compile_context>
chip_gen: v7x
topology: tpu7x:2x2x1
jax: 0.10.0
libtpu: 0.0.40
codegen_flags: <defaults>
</compile_context>

<pallas_src>
import functools
import math

import numpy as np
import jax
import jax.numpy as jnp
from jax.experimental import pallas as pl
from jax.experimental.pallas import tpu as pltpu

EPS = 1e-5  # nn.LayerNorm default


def _fused_encoder_kernel(x_ref, pos_ref, mask_ref,
                          wqkv_ref, bqkv_ref, wo_ref, bo_ref,
                          w1_ref, b1_ref, w2_ref, b2_ref,
                          g1_ref, be1_ref, g2_ref, be2_ref,
                          out_ref, act_ref,
                          *, nhead, head_dim, num_layers, btile, seq, mxu_dtype,
                          approx_recip):
    l = pl.program_id(1)
    E = nhead * head_dim
    M = btile * seq
    n_heads_total = btile * nhead

    # Layer 0: load this batch tile, add positional encoding; the activation then stays
    # resident in VMEM (act_ref) for every subsequent layer step of this batch tile.
    @pl.when(l == 0)
    def _():
        act_ref[...] = (x_ref[...] + pos_ref[...]).reshape(M, E)

    h = act_ref[...]                                    # (M, E) float32
    hx = h.astype(mxu_dtype)                            # cast once per layer

    # ---- fused QKV projection: one (M, E) x (E, 3E) matmul (q-scale pre-folded) -------
    qkv = (jnp.dot(hx, wqkv_ref[l], preferred_element_type=jnp.float32)
           + bqkv_ref[l])                               # (M, 3E) f32

    def gather_heads(col0):
        # (M, 3E) -> (btile*H, S, hd): static slices + one stack.  A reshape+swapaxes
        # would be fewer ops but needs a mid-axis transpose; slices+stack is the
        # Mosaic-safe relayout here (btile*H is small and fully unrolled).
        parts = [qkv[b * seq:(b + 1) * seq,
                     col0 + hh * head_dim: col0 + (hh + 1) * head_dim]
                 for b in range(btile) for hh in range(nhead)]
        return jnp.stack(parts, axis=0).astype(mxu_dtype)

    qh = gather_heads(0)                                # (btile*H, S, hd)
    kh = gather_heads(E)
    vh = gather_heads(2 * E)

    # ---- multi-head attention: all (batch-tile, head) pairs batched into one einsum ---
    s = jnp.einsum('nqd,nkd->nqk', qh, kh,
                   preferred_element_type=jnp.float32)  # (btile*H, S, S) f32
    s = s.reshape(btile, nhead, seq, seq) + mask_ref[...]   # (btile,1,1,S) broadcasts
    m = jnp.max(s, axis=-1, keepdims=True)
    p = jnp.exp(s - m)
    p = p * pl.reciprocal(jnp.sum(p, axis=-1, keepdims=True), approx=approx_recip)
    p = p.reshape(n_heads_total, seq, seq).astype(mxu_dtype)
    o = jnp.einsum('nqk,nkd->nqd', p, vh,
                   preferred_element_type=jnp.float32)  # (btile*H, S, hd) f32

    # ---- output projection with head re-assembly folded in (no concat) -----------------
    # wo_ref[l] is (H, hd, E); batch-matmul per head, then f32 sum over heads.
    wo_l = wo_ref[l]
    wo_n = jnp.broadcast_to(wo_l[None], (btile, nhead, head_dim, E)
                            ).reshape(n_heads_total, head_dim, E)
    proj = jnp.einsum('nsd,nde->nse', o.astype(mxu_dtype), wo_n,
                      preferred_element_type=jnp.float32)        # (btile*H, S, E)
    attn = jnp.sum(proj.reshape(btile, nhead, seq, E), axis=1)   # sum over heads
    attn = attn.reshape(M, E) + bo_ref[l]

    # ---- residual + LayerNorm 1 (post-norm, norm_first=False) -------------------------
    h1 = h + attn
    mu = jnp.mean(h1, axis=-1, keepdims=True)
    var = jnp.mean((h1 - mu) ** 2, axis=-1, keepdims=True)
    h1 = (h1 - mu) * jax.lax.rsqrt(var + EPS) * g1_ref[l] + be1_ref[l]

    # ---- feed-forward (dim_feedforward = 4*E, ReLU) ------------------------------------
    f = jnp.maximum(jnp.dot(h1.astype(mxu_dtype), w1_ref[l],
                            preferred_element_type=jnp.float32) + b1_ref[l], 0.0)
    f = (jnp.dot(f.astype(mxu_dtype), w2_ref[l],
                 preferred_element_type=jnp.float32) + b2_ref[l])

    # ---- residual + LayerNorm 2 ---------------------------------------------------------
    h2 = h1 + f
    mu = jnp.mean(h2, axis=-1, keepdims=True)
    var = jnp.mean((h2 - mu) ** 2, axis=-1, keepdims=True)
    y = (h2 - mu) * jax.lax.rsqrt(var + EPS) * g2_ref[l] + be2_ref[l]

    act_ref[...] = y                                    # carry to next layer step

    @pl.when(l == num_layers - 1)
    def _():
        out_ref[...] = y.reshape(btile, seq, E)         # written back to HBM once per b


def inter_sensor_transformer(x, src_key_padding_mask, pos_encoder, params, nhead,
                             *, mxu_dtype=jnp.bfloat16, batch_blocks=None):
    """Forward pass. x: (B, S, E) f32; src_key_padding_mask: (B, S) bool (True = pad)."""
    B, S, E = x.shape
    L = params["wqkvT"].shape[0]
    head_dim = E // nhead
    if batch_blocks is None:
        # Keep a >=2-way "parallel" batch axis (both v7x TensorCores busy); any remaining
        # batch rows are folded into the matmul M dimension of each grid step.
        batch_blocks = 2 if (B >= 2 and B % 2 == 0) else 1
    assert B % batch_blocks == 0
    btile = B // batch_blocks

    pos = pos_encoder[:, :S, :]
    # Additive key-padding mask kept O(S) per batch element (no (B,S,S) materialization).
    amask = jnp.where(src_key_padding_mask, jnp.float32(-1e30),
                      jnp.float32(0.0))[:, None, None, :]            # (B, 1, 1, S)

    # Host-side weight prep: fold 1/sqrt(head_dim) into the q columns of Wqkv/bqkv,
    # reshape Wo to (L, H, hd, E) (head re-assembly folded into the projection), and
    # optionally cast matmul operands to bf16 (halves the one-time weight DMA).
    scale = 1.0 / math.sqrt(head_dim)
    wqkvT = params["wqkvT"].at[:, :, :E].multiply(scale)
    bqkv = params["bqkv"].at[:, :, :E].multiply(scale)
    woT_h = params["woT"].reshape(L, nhead, head_dim, E)
    mats = {"wqkvT": wqkvT, "woT": woT_h, "w1T": params["w1T"], "w2T": params["w2T"]}
    if mxu_dtype != jnp.float32:
        mats = {k: v.astype(mxu_dtype) for k, v in mats.items()}

    kernel = functools.partial(
        _fused_encoder_kernel, nhead=nhead, head_dim=head_dim, num_layers=L,
        btile=btile, seq=S, mxu_dtype=mxu_dtype,
        approx_recip=(mxu_dtype != jnp.float32))

    def resident(arr):
        # Full-extent block + constant index_map: DMA'd from HBM exactly once, then
        # VMEM-resident for the entire grid (layer selected in-kernel via ref[l]).
        zeros = (0,) * arr.ndim
        return pl.BlockSpec(arr.shape, lambda b, l: zeros)

    operands = (x, pos, amask,
                mats["wqkvT"], bqkv, mats["woT"], params["bo"],
                mats["w1T"], params["b1"], mats["w2T"], params["b2"],
                params["g1"], params["be1"], params["g2"], params["be2"])

    in_specs = [
        pl.BlockSpec((btile, S, E), lambda b, l: (b, 0, 0)),        # x (fetched once / b)
        pl.BlockSpec((1, S, E), lambda b, l: (0, 0, 0)),            # pos encoder
        pl.BlockSpec((btile, 1, 1, S), lambda b, l: (b, 0, 0, 0)),  # additive mask
    ] + [resident(a) for a in operands[3:]]                         # all weights resident

    return pl.pallas_call(
        kernel,
        out_shape=jax.ShapeDtypeStruct((B, S, E), jnp.float32),
        grid_spec=pltpu.PrefetchScalarGridSpec(
            num_scalar_prefetch=0,
            grid=(batch_blocks, L),         # batch parallel (megacore), layers sequential
            in_specs=in_specs,
            out_specs=pl.BlockSpec((btile, S, E), lambda b, l: (b, 0, 0)),
            scratch_shapes=[pltpu.VMEM((btile * S, E), jnp.float32)],  # resident act
        ),
        compiler_params=pltpu.CompilerParams(
            dimension_semantics=("parallel", "arbitrary")),
    )(*operands)


# ------------------------- deterministic parameter init (stacked over layers) ----------
def init_params(key, embed_dim, num_layers):
    E, F = embed_dim, 4 * embed_dim
    names = ("wqkvT", "bqkv", "woT", "bo", "w1T", "b1", "w2T", "b2",
             "g1", "be1", "g2", "be2")
    acc = {n: [] for n in names}
    for l in range(num_layers):
        ks = jax.random.split(jax.random.fold_in(key, 1000 + l), 8)
        in_proj_w = jax.random.normal(ks[0], (3 * E, E), jnp.float32) * (E ** -0.5)
        in_proj_b = jax.random.normal(ks[1], (3 * E,), jnp.float32) * 0.01
        out_w = jax.random.normal(ks[2], (E, E), jnp.float32) * (E ** -0.5)
        out_b = jax.random.normal(ks[3], (E,), jnp.float32) * 0.01
        w1 = jax.random.normal(ks[4], (F, E), jnp.float32) * (E ** -0.5)
        b1 = jax.random.normal(ks[5], (F,), jnp.float32) * 0.01
        w2 = jax.random.normal(ks[6], (E, F), jnp.float32) * (F ** -0.5)
        b2 = jax.random.normal(ks[7], (E,), jnp.float32) * 0.01
        acc["wqkvT"].append(in_proj_w.T)               # (E, 3E): q | k | v columns
        acc["bqkv"].append(in_proj_b.reshape(1, 3 * E))
        acc["woT"].append(out_w.T)
        acc["bo"].append(out_b.reshape(1, E))
        acc["w1T"].append(w1.T)
        acc["b1"].append(b1.reshape(1, F))
        acc["w2T"].append(w2.T)
        acc["b2"].append(b2.reshape(1, E))
        acc["g1"].append(jnp.ones((1, E), jnp.float32))
        acc["be1"].append(jnp.zeros((1, E), jnp.float32))
        acc["g2"].append(jnp.ones((1, E), jnp.float32))
        acc["be2"].append(jnp.zeros((1, E), jnp.float32))
    return {n: jnp.stack(v, axis=0) for n, v in acc.items()}


# ------------------------- numpy (float64) reference ------------------------------------
def reference_forward(x, src_key_padding_mask, pos_encoder, params, nhead):
    x = np.asarray(x, np.float64) + np.asarray(pos_encoder, np.float64)[:, :x.shape[1], :]
    B, S, E = x.shape
    hd = E // nhead
    L = params["wqkvT"].shape[0]
    amask = np.where(np.asarray(src_key_padding_mask), -1e30, 0.0)[:, None, :]  # (B,1,S)
    g = {k: np.asarray(v, np.float64) for k, v in params.items()}
    for l in range(L):
        qkv = x @ g["wqkvT"][l] + g["bqkv"][l]
        q, k, v = qkv[..., :E], qkv[..., E:2 * E], qkv[..., 2 * E:]
        outs = []
        for h in range(nhead):
            sl = slice(h * hd, (h + 1) * hd)
            s = np.einsum("bqd,bkd->bqk", q[..., sl], k[..., sl]) / math.sqrt(hd) + amask
            s = s - s.max(-1, keepdims=True)
            pw = np.exp(s)
            pw = pw / pw.sum(-1, keepdims=True)
            outs.append(np.einsum("bqk,bkd->bqd", pw, v[..., sl]))
        attn = np.concatenate(outs, -1) @ g["woT"][l] + g["bo"][l]
        h1 = x + attn
        mu = h1.mean(-1, keepdims=True)
        var = ((h1 - mu) ** 2).mean(-1, keepdims=True)
        h1 = (h1 - mu) / np.sqrt(var + EPS) * g["g1"][l] + g["be1"][l]
        f = np.maximum(h1 @ g["w1T"][l] + g["b1"][l], 0.0) @ g["w2T"][l] + g["b2"][l]
        h2 = h1 + f
        mu = h2.mean(-1, keepdims=True)
        var = ((h2 - mu) ** 2).mean(-1, keepdims=True)
        x = (h2 - mu) / np.sqrt(var + EPS) * g["g2"][l] + g["be2"][l]
    return x


if __name__ == "__main__":
    # embed_dim=32, nhead=4, num_layers=2, max_sensors=8, batch=2
    B, S, E, H, L = 2, 8, 32, 4, 2
    key = jax.random.PRNGKey(0)
    k_x, k_pos, k_par = jax.random.split(key, 3)

    x = jax.random.normal(k_x, (B, S, E), jnp.float32)
    # nn.Parameter(torch.zeros(1, max_sensors, embed_dim)); small random values here to
    # exercise the add path.
    pos_encoder = 0.02 * jax.random.normal(k_pos, (1, S, E), jnp.float32)
    # key padding mask: True = padded sensor (ignored as attention key)
    src_key_padding_mask = jnp.zeros((B, S), dtype=bool).at[1, -2:].set(True)

    params = init_params(k_par, E, L)

    # f32 MXU path: strict check against the float64 reference.
    out = inter_sensor_transformer(x, src_key_padding_mask, pos_encoder, params, H,
                                   mxu_dtype=jnp.float32)
    out = jax.block_until_ready(out)
    ref = reference_forward(x, src_key_padding_mask, pos_encoder, params, H)
    if not np.allclose(np.asarray(out, np.float64), ref, atol=2e-3, rtol=2e-3):
        raise AssertionError("Pallas kernel (f32 MXU) output mismatch vs reference")

    # Default fast path: bf16 MXU operands / f32 accumulation (halved weight DMA, 2x MXU
    # rate on v5e/v6e/v7x); loose sanity check only, bf16 trades precision for throughput.
    out_fast = inter_sensor_transformer(x, src_key_padding_mask, pos_encoder, params, H)
    out_fast = jax.block_until_ready(out_fast)
    if not np.allclose(np.asarray(out_fast, np.float64), ref, atol=3e-1, rtol=1e-1):
        raise AssertionError("Pallas kernel (bf16 MXU) output diverged from reference")

    # TODO(synk): dropout layers are treated as eval-mode identity (no RNG path).
    print("KERNEL_OK")
</pallas_src>

<mosaic_0001>
module attributes {stable_mosaic.version = 11 : i64} {
  func.func @_fused_encoder_kernel(%arg0: i32, %arg1: i32, %arg2: memref<1x8x32xf32, #tpu.memory_space<vmem>>, %arg3: memref<1x8x32xf32, #tpu.memory_space<vmem>>, %arg4: memref<1x1x1x8xf32, #tpu.memory_space<vmem>>, %arg5: memref<2x32x96xf32, #tpu.memory_space<vmem>>, %arg6: memref<2x1x96xf32, #tpu.memory_space<vmem>>, %arg7: memref<2x4x8x32xf32, #tpu.memory_space<vmem>>, %arg8: memref<2x1x32xf32, #tpu.memory_space<vmem>>, %arg9: memref<2x32x128xf32, #tpu.memory_space<vmem>>, %arg10: memref<2x1x128xf32, #tpu.memory_space<vmem>>, %arg11: memref<2x128x32xf32, #tpu.memory_space<vmem>>, %arg12: memref<2x1x32xf32, #tpu.memory_space<vmem>>, %arg13: memref<2x1x32xf32, #tpu.memory_space<vmem>>, %arg14: memref<2x1x32xf32, #tpu.memory_space<vmem>>, %arg15: memref<2x1x32xf32, #tpu.memory_space<vmem>>, %arg16: memref<2x1x32xf32, #tpu.memory_space<vmem>>, %arg17: memref<1x8x32xf32, #tpu.memory_space<vmem>>, %arg18: memref<8x32xf32, #tpu.memory_space<vmem>>) attributes {dimension_semantics = [#tpu.dimension_semantics<parallel>, #tpu.dimension_semantics<arbitrary>], iteration_bounds = array<i64: 2, 2>, scalar_prefetch = 0 : i64, scratch_operands = 1 : i64, tpu.core_type = #tpu.core_type<tc>, window_params = [{transform_indices = @transform_0, window_bounds = array<i64: 1, 8, 32>}, {pipeline_mode = #tpu.pipeline_mode<synchronous>, transform_indices = @transform_1, window_bounds = array<i64: 1, 8, 32>}, {transform_indices = @transform_2, window_bounds = array<i64: 1, 1, 1, 8>}, {pipeline_mode = #tpu.pipeline_mode<synchronous>, transform_indices = @transform_3, window_bounds = array<i64: 2, 32, 96>}, {pipeline_mode = #tpu.pipeline_mode<synchronous>, transform_indices = @transform_4, window_bounds = array<i64: 2, 1, 96>}, {pipeline_mode = #tpu.pipeline_mode<synchronous>, transform_indices = @transform_5, window_bounds = array<i64: 2, 4, 8, 32>}, {pipeline_mode = #tpu.pipeline_mode<synchronous>, transform_indices = @transform_6, window_bounds = array<i64: 2, 1, 32>}, {pipeline_mode = #tpu.pipeline_mode<synchronous>, transform_indices = @transform_7, window_bounds = array<i64: 2, 32, 128>}, {pipeline_mode = #tpu.pipeline_mode<synchronous>, transform_indices = @transform_8, window_bounds = array<i64: 2, 1, 128>}, {pipeline_mode = #tpu.pipeline_mode<synchronous>, transform_indices = @transform_9, window_bounds = array<i64: 2, 128, 32>}, {pipeline_mode = #tpu.pipeline_mode<synchronous>, transform_indices = @transform_10, window_bounds = array<i64: 2, 1, 32>}, {pipeline_mode = #tpu.pipeline_mode<synchronous>, transform_indices = @transform_11, window_bounds = array<i64: 2, 1, 32>}, {pipeline_mode = #tpu.pipeline_mode<synchronous>, transform_indices = @transform_12, window_bounds = array<i64: 2, 1, 32>}, {pipeline_mode = #tpu.pipeline_mode<synchronous>, transform_indices = @transform_13, window_bounds = array<i64: 2, 1, 32>}, {pipeline_mode = #tpu.pipeline_mode<synchronous>, transform_indices = @transform_14, window_bounds = array<i64: 2, 1, 32>}, {transform_indices = @transform_15, window_bounds = array<i64: 1, 8, 32>}]} {
    %c0_i32 = arith.constant 0 : i32
    %0 = arith.cmpi eq, %arg1, %c0_i32 : i32
    %1 = arith.extui %0 : i1 to i32
    %c0_i32_0 = arith.constant 0 : i32
    %2 = arith.cmpi ne, %1, %c0_i32_0 : i32
    scf.if %2 {
      %c0_53 = arith.constant 0 : index
      %c0_54 = arith.constant 0 : index
      %c0_55 = arith.constant 0 : index
      %153 = vector.load %arg2[%c0_53, %c0_54, %c0_55] : memref<1x8x32xf32, #tpu.memory_space<vmem>>, vector<1x8x32xf32>
      %c0_56 = arith.constant 0 : index
      %c0_57 = arith.constant 0 : index
      %c0_58 = arith.constant 0 : index
      %154 = vector.load %arg3[%c0_56, %c0_57, %c0_58] : memref<1x8x32xf32, #tpu.memory_space<vmem>>, vector<1x8x32xf32>
      %155 = arith.addf %153, %154 : vector<1x8x32xf32>
      %156 = vector.shape_cast %155 : vector<1x8x32xf32> to vector<8x32xf32>
      %c0_59 = arith.constant 0 : index
      %c0_60 = arith.constant 0 : index
      %157 = vector.load %arg18[%c0_59, %c0_60] : memref<8x32xf32, #tpu.memory_space<vmem>>, vector<8x32xf32>
      tpu.vector_store %arg18[%c0_59, %c0_60], %156 {strides = array<i32>} : memref<8x32xf32, #tpu.memory_space<vmem>>, vector<8x32xf32>,
    } else {
    }
    %c0 = arith.constant 0 : index
    %c0_1 = arith.constant 0 : index
    %3 = vector.load %arg18[%c0, %c0_1] : memref<8x32xf32, #tpu.memory_space<vmem>>, vector<8x32xf32>
    %4 = arith.index_cast %arg1 : i32 to index
    %c0_2 = arith.constant 0 : index
    %c0_3 = arith.constant 0 : index
    %5 = vector.load %arg5[%4, %c0_2, %c0_3] : memref<2x32x96xf32, #tpu.memory_space<vmem>>, vector<1x32x96xf32>
    %6 = vector.shape_cast %5 : vector<1x32x96xf32> to vector<32x96xf32>
    %cst = arith.constant dense<0.000000e+00> : vector<8x96xf32>
    %7 = tpu.matmul %3, %6, %cst {dimension_numbers = #tpu.dot_dimension_numbers<[1], [0], [0], [1], [0, 0, 1, 1], [], []>} : vector<8x32xf32>, vector<32x96xf32>, vector<8x96xf32> -> vector<8x96xf32>
    %8 = arith.index_cast %arg1 : i32 to index
    %c0_4 = arith.constant 0 : index
    %c0_5 = arith.constant 0 : index
    %9 = vector.load %arg6[%8, %c0_4, %c0_5] : memref<2x1x96xf32, #tpu.memory_space<vmem>>, vector<1x1x96xf32>
    %10 = vector.shape_cast %9 : vector<1x1x96xf32> to vector<1x96xf32>
    %11 = vector.broadcast %10 : vector<1x96xf32> to vector<8x96xf32>
    %12 = arith.addf %7, %11 : vector<8x96xf32>
    %13 = vector.extract_strided_slice %12 {offsets = [0, 0], sizes = [8, 8], strides = [1, 1]} : vector<8x96xf32> to vector<8x8xf32>
    %14 = vector.extract_strided_slice %12 {offsets = [0, 8], sizes = [8, 8], strides = [1, 1]} : vector<8x96xf32> to vector<8x8xf32>
    %15 = vector.extract_strided_slice %12 {offsets = [0, 16], sizes = [8, 8], strides = [1, 1]} : vector<8x96xf32> to vector<8x8xf32>
    %16 = vector.extract_strided_slice %12 {offsets = [0, 24], sizes = [8, 8], strides = [1, 1]} : vector<8x96xf32> to vector<8x8xf32>
    %17 = vector.shape_cast %13 : vector<8x8xf32> to vector<1x8x8xf32>
    %18 = vector.shape_cast %14 : vector<8x8xf32> to vector<1x8x8xf32>
    %19 = vector.shape_cast %15 : vector<8x8xf32> to vector<1x8x8xf32>
    %20 = vector.shape_cast %16 : vector<8x8xf32> to vector<1x8x8xf32>
    %21 = tpu.concatenate %17, %18, %19, %20 in 0 : vector<1x8x8xf32>, vector<1x8x8xf32>, vector<1x8x8xf32>, vector<1x8x8xf32> -> vector<4x8x8xf32>
    %22 = vector.extract_strided_slice %12 {offsets = [0, 32], sizes = [8, 8], strides = [1, 1]} : vector<8x96xf32> to vector<8x8xf32>
    %23 = vector.extract_strided_slice %12 {offsets = [0, 40], sizes = [8, 8], strides = [1, 1]} : vector<8x96xf32> to vector<8x8xf32>
    %24 = vector.extract_strided_slice %12 {offsets = [0, 48], sizes = [8, 8], strides = [1, 1]} : vector<8x96xf32> to vector<8x8xf32>
    %25 = vector.extract_strided_slice %12 {offsets = [0, 56], sizes = [8, 8], strides = [1, 1]} : vector<8x96xf32> to vector<8x8xf32>
    %26 = vector.shape_cast %22 : vector<8x8xf32> to vector<1x8x8xf32>
    %27 = vector.shape_cast %23 : vector<8x8xf32> to vector<1x8x8xf32>
    %28 = vector.shape_cast %24 : vector<8x8xf32> to vector<1x8x8xf32>
    %29 = vector.shape_cast %25 : vector<8x8xf32> to vector<1x8x8xf32>
    %30 = tpu.concatenate %26, %27, %28, %29 in 0 : vector<1x8x8xf32>, vector<1x8x8xf32>, vector<1x8x8xf32>, vector<1x8x8xf32> -> vector<4x8x8xf32>
    %31 = vector.extract_strided_slice %12 {offsets = [0, 64], sizes = [8, 8], strides = [1, 1]} : vector<8x96xf32> to vector<8x8xf32>
    %32 = vector.extract_strided_slice %12 {offsets = [0, 72], sizes = [8, 8], strides = [1, 1]} : vector<8x96xf32> to vector<8x8xf32>
    %33 = vector.extract_strided_slice %12 {offsets = [0, 80], sizes = [8, 8], strides = [1, 1]} : vector<8x96xf32> to vector<8x8xf32>
    %34 = vector.extract_strided_slice %12 {offsets = [0, 88], sizes = [8, 8], strides = [1, 1]} : vector<8x96xf32> to vector<8x8xf32>
    %35 = vector.shape_cast %31 : vector<8x8xf32> to vector<1x8x8xf32>
    %36 = vector.shape_cast %32 : vector<8x8xf32> to vector<1x8x8xf32>
    %37 = vector.shape_cast %33 : vector<8x8xf32> to vector<1x8x8xf32>
    %38 = vector.shape_cast %34 : vector<8x8xf32> to vector<1x8x8xf32>
    %39 = tpu.concatenate %35, %36, %37, %38 in 0 : vector<1x8x8xf32>, vector<1x8x8xf32>, vector<1x8x8xf32>, vector<1x8x8xf32> -> vector<4x8x8xf32>
    "tpu.trace_start"() <{level = 10 : i32, message = "nqd,nkd->nqk"}> : () -> ()
    %cst_6 = arith.constant dense<0.000000e+00> : vector<4x8x8xf32>
    %40 = tpu.matmul %21, %30, %cst_6 {dimension_numbers = #tpu.dot_dimension_numbers<[2], [2], [1], [1], [0, 0, 0, 1, 1, 1], [0], [0]>} : vector<4x8x8xf32>, vector<4x8x8xf32>, vector<4x8x8xf32> -> vector<4x8x8xf32>
    "tpu.trace_stop"() : () -> ()
    %41 = vector.shape_cast %40 : vector<4x8x8xf32> to vector<1x4x8x8xf32>
    %c0_7 = arith.constant 0 : index
    %c0_8 = arith.constant 0 : index
    %c0_9 = arith.constant 0 : index
    %c0_10 = arith.constant 0 : index
    %42 = vector.load %arg4[%c0_7, %c0_8, %c0_9, %c0_10] : memref<1x1x1x8xf32, #tpu.memory_space<vmem>>, vector<1x1x1x8xf32>
    %43 = vector.broadcast %42 : vector<1x1x1x8xf32> to vector<1x4x8x8xf32>
    %44 = arith.addf %41, %43 : vector<1x4x8x8xf32>
    %cst_11 = arith.constant dense<0xFF800000> : vector<1x4x8xf32>
    %45 = vector.multi_reduction <maximumf>, %44, %cst_11 [3] : vector<1x4x8x8xf32> to vector<1x4x8xf32>
    %46 = vector.shape_cast %45 : vector<1x4x8xf32> to vector<1x4x8x1xf32>
    %47 = vector.broadcast %46 : vector<1x4x8x1xf32> to vector<1x4x8x8xf32>
    %48 = arith.subf %44, %47 : vector<1x4x8x8xf32>
    %49 = math.exp %48 : vector<1x4x8x8xf32>
    %cst_12 = arith.constant dense<0.000000e+00> : vector<1x4x8xf32>
    %50 = vector.multi_reduction <add>, %49, %cst_12 [3] : vector<1x4x8x8xf32> to vector<1x4x8xf32>
    %51 = vector.shape_cast %50 : vector<1x4x8xf32> to vector<1x4x8x1xf32>
    %52 = tpu.reciprocal %51 : vector<1x4x8x1xf32> -> vector<1x4x8x1xf32>
    %53 = vector.broadcast %52 : vector<1x4x8x1xf32> to vector<1x4x8x8xf32>
    %54 = arith.mulf %49, %53 : vector<1x4x8x8xf32>
    %55 = vector.shape_cast %54 : vector<1x4x8x8xf32> to vector<4x8x8xf32>
    "tpu.trace_start"() <{level = 10 : i32, message = "nqk,nkd->nqd"}> : () -> ()
    %cst_13 = arith.constant dense<0.000000e+00> : vector<4x8x8xf32>
    %56 = tpu.matmul %55, %39, %cst_13 {dimension_numbers = #tpu.dot_dimension_numbers<[2], [1], [1], [2], [0, 0, 0, 1, 1, 2], [0], [0]>} : vector<4x8x8xf32>, vector<4x8x8xf32>, vector<4x8x8xf32> -> vector<4x8x8xf32>
    "tpu.trace_stop"() : () -> ()
    %57 = arith.index_cast %arg1 : i32 to index
    %c0_14 = arith.constant 0 : index
    %c0_15 = arith.constant 0 : index
    %c0_16 = arith.constant 0 : index
    %58 = vector.load %arg7[%57, %c0_14, %c0_15, %c0_16] : memref<2x4x8x32xf32, #tpu.memory_space<vmem>>, vector<1x4x8x32xf32>
    %59 = vector.shape_cast %58 : vector<1x4x8x32xf32> to vector<4x8x32xf32>
    %60 = vector.shape_cast %59 : vector<4x8x32xf32> to vector<1x4x8x32xf32>
    %61 = vector.shape_cast %60 : vector<1x4x8x32xf32> to vector<4x8x32xf32>
    "tpu.trace_start"() <{level = 10 : i32, message = "nsd,nde->nse"}> : () -> ()
    %cst_17 = arith.constant dense<0.000000e+00> : vector<4x8x32xf32>
    %62 = tpu.matmul %56, %61, %cst_17 {dimension_numbers = #tpu.dot_dimension_numbers<[2], [1], [1], [2], [0, 0, 0, 1, 1, 2], [0], [0]>} : vector<4x8x8xf32>, vector<4x8x32xf32>, vector<4x8x32xf32> -> vector<4x8x32xf32>
    "tpu.trace_stop"() : () -> ()
    %63 = vector.shape_cast %62 : vector<4x8x32xf32> to vector<1x4x8x32xf32>
    %cst_18 = arith.constant dense<0.000000e+00> : vector<1x8x32xf32>
    %64 = vector.multi_reduction <add>, %63, %cst_18 [1] : vector<1x4x8x32xf32> to vector<1x8x32xf32>
    %65 = vector.shape_cast %64 : vector<1x8x32xf32> to vector<8x32xf32>
    %66 = arith.index_cast %arg1 : i32 to index
    %c0_19 = arith.constant 0 : index
    %c0_20 = arith.constant 0 : index
    %67 = vector.load %arg8[%66, %c0_19, %c0_20] : memref<2x1x32xf32, #tpu.memory_space<vmem>>, vector<1x1x32xf32>
    %68 = vector.shape_cast %67 : vector<1x1x32xf32> to vector<1x32xf32>
    %69 = vector.broadcast %68 : vector<1x32xf32> to vector<8x32xf32>
    %70 = arith.addf %65, %69 : vector<8x32xf32>
    %71 = arith.addf %3, %70 : vector<8x32xf32>
    %cst_21 = arith.constant dense<0.000000e+00> : vector<8xf32>
    %72 = vector.multi_reduction <add>, %71, %cst_21 [1] : vector<8x32xf32> to vector<8xf32>
    %73 = vector.shape_cast %72 : vector<8xf32> to vector<8x1xf32>
    %cst_22 = arith.constant 3.200000e+01 : f32
    %74 = vector.broadcast %cst_22 : f32 to vector<8x1xf32>
    %75 = arith.divf %73, %74 : vector<8x1xf32>
    %76 = vector.broadcast %75 : vector<8x1xf32> to vector<8x32xf32>
    %77 = arith.subf %71, %76 : vector<8x32xf32>
    %78 = arith.mulf %77, %77 : vector<8x32xf32>
    %cst_23 = arith.constant dense<0.000000e+00> : vector<8xf32>
    %79 = vector.multi_reduction <add>, %78, %cst_23 [1] : vector<8x32xf32> to vector<8xf32>
    %80 = vector.shape_cast %79 : vector<8xf32> to vector<8x1xf32>
    %cst_24 = arith.constant 3.200000e+01 : f32
    %81 = vector.broadcast %cst_24 : f32 to vector<8x1xf32>
    %82 = arith.divf %80, %81 : vector<8x1xf32>
    %83 = vector.broadcast %75 : vector<8x1xf32> to vector<8x32xf32>
    %84 = arith.subf %71, %83 : vector<8x32xf32>
    %cst_25 = arith.constant 9.99999974E-6 : f32
    %85 = vector.broadcast %cst_25 : f32 to vector<8x1xf32>
    %86 = arith.addf %82, %85 : vector<8x1xf32>
    %87 = math.rsqrt %86 : vector<8x1xf32>
    %88 = vector.broadcast %87 : vector<8x1xf32> to vector<8x32xf32>
    %89 = arith.mulf %84, %88 : vector<8x32xf32>
    %90 = arith.index_cast %arg1 : i32 to index
    %c0_26 = arith.constant 0 : index
    %c0_27 = arith.constant 0 : index
    %91 = vector.load %arg13[%90, %c0_26, %c0_27] : memref<2x1x32xf32, #tpu.memory_space<vmem>>, vector<1x1x32xf32>
    %92 = vector.shape_cast %91 : vector<1x1x32xf32> to vector<1x32xf32>
    %93 = vector.broadcast %92 : vector<1x32xf32> to vector<8x32xf32>
    %94 = arith.mulf %89, %93 : vector<8x32xf32>
    %95 = arith.index_cast %arg1 : i32 to index
    %c0_28 = arith.constant 0 : index
    %c0_29 = arith.constant 0 : index
    %96 = vector.load %arg14[%95, %c0_28, %c0_29] : memref<2x1x32xf32, #tpu.memory_space<vmem>>, vector<1x1x32xf32>
    %97 = vector.shape_cast %96 : vector<1x1x32xf32> to vector<1x32xf32>
    %98 = vector.broadcast %97 : vector<1x32xf32> to vector<8x32xf32>
    %99 = arith.addf %94, %98 : vector<8x32xf32>
    %100 = arith.index_cast %arg1 : i32 to index
    %c0_30 = arith.constant 0 : index
    %c0_31 = arith.constant 0 : index
    %101 = vector.load %arg9[%100, %c0_30, %c0_31] : memref<2x32x128xf32, #tpu.memory_space<vmem>>, vector<1x32x128xf32>
    %102 = vector.shape_cast %101 : vector<1x32x128xf32> to vector<32x128xf32>
    %cst_32 = arith.constant dense<0.000000e+00> : vector<8x128xf32>
    %103 = tpu.matmul %99, %102, %cst_32 {dimension_numbers = #tpu.dot_dimension_numbers<[1], [0], [0], [1], [0, 0, 1, 1], [], []>} : vector<8x32xf32>, vector<32x128xf32>, vector<8x128xf32> -> vector<8x128xf32>
    %104 = arith.index_cast %arg1 : i32 to index
    %c0_33 = arith.constant 0 : index
    %c0_34 = arith.constant 0 : index
    %105 = vector.load %arg10[%104, %c0_33, %c0_34] : memref<2x1x128xf32, #tpu.memory_space<vmem>>, vector<1x1x128xf32>
    %106 = vector.shape_cast %105 : vector<1x1x128xf32> to vector<1x128xf32>
    %107 = vector.broadcast %106 : vector<1x128xf32> to vector<8x128xf32>
    %108 = arith.addf %103, %107 : vector<8x128xf32>
    %cst_35 = arith.constant 0.000000e+00 : f32
    %109 = vector.broadcast %cst_35 : f32 to vector<8x128xf32>
    %110 = arith.maximumf %108, %109 : vector<8x128xf32>
    %111 = arith.index_cast %arg1 : i32 to index
    %c0_36 = arith.constant 0 : index
    %c0_37 = arith.constant 0 : index
    %112 = vector.load %arg11[%111, %c0_36, %c0_37] : memref<2x128x32xf32, #tpu.memory_space<vmem>>, vector<1x128x32xf32>
    %113 = vector.shape_cast %112 : vector<1x128x32xf32> to vector<128x32xf32>
    %cst_38 = arith.constant dense<0.000000e+00> : vector<8x32xf32>
    %114 = tpu.matmul %110, %113, %cst_38 {dimension_numbers = #tpu.dot_dimension_numbers<[1], [0], [0], [1], [0, 0, 1, 1], [], []>} : vector<8x128xf32>, vector<128x32xf32>, vector<8x32xf32> -> vector<8x32xf32>
    %115 = arith.index_cast %arg1 : i32 to index
    %c0_39 = arith.constant 0 : index
    %c0_40 = arith.constant 0 : index
    %116 = vector.load %arg12[%115, %c0_39, %c0_40] : memref<2x1x32xf32, #tpu.memory_space<vmem>>, vector<1x1x32xf32>
    %117 = vector.shape_cast %116 : vector<1x1x32xf32> to vector<1x32xf32>
    %118 = vector.broadcast %117 : vector<1x32xf32> to vector<8x32xf32>
    %119 = arith.addf %114, %118 : vector<8x32xf32>
    %120 = arith.addf %99, %119 : vector<8x32xf32>
    %cst_41 = arith.constant dense<0.000000e+00> : vector<8xf32>
    %121 = vector.multi_reduction <add>, %120, %cst_41 [1] : vector<8x32xf32> to vector<8xf32>
    %122 = vector.shape_cast %121 : vector<8xf32> to vector<8x1xf32>
    %cst_42 = arith.constant 3.200000e+01 : f32
    %123 = vector.broadcast %cst_42 : f32 to vector<8x1xf32>
    %124 = arith.divf %122, %123 : vector<8x1xf32>
    %125 = vector.broadcast %124 : vector<8x1xf32> to vector<8x32xf32>
    %126 = arith.subf %120, %125 : vector<8x32xf32>
    %127 = arith.mulf %126, %126 : vector<8x32xf32>
    %cst_43 = arith.constant dense<0.000000e+00> : vector<8xf32>
    %128 = vector.multi_reduction <add>, %127, %cst_43 [1] : vector<8x32xf32> to vector<8xf32>
    %129 = vector.shape_cast %128 : vector<8xf32> to vector<8x1xf32>
    %cst_44 = arith.constant 3.200000e+01 : f32
    %130 = vector.broadcast %cst_44 : f32 to vector<8x1xf32>
    %131 = arith.divf %129, %130 : vector<8x1xf32>
    %132 = vector.broadcast %124 : vector<8x1xf32> to vector<8x32xf32>
    %133 = arith.subf %120, %132 : vector<8x32xf32>
    %cst_45 = arith.constant 9.99999974E-6 : f32
    %134 = vector.broadcast %cst_45 : f32 to vector<8x1xf32>
    %135 = arith.addf %131, %134 : vector<8x1xf32>
    %136 = math.rsqrt %135 : vector<8x1xf32>
    %137 = vector.broadcast %136 : vector<8x1xf32> to vector<8x32xf32>
    %138 = arith.mulf %133, %137 : vector<8x32xf32>
    %139 = arith.index_cast %arg1 : i32 to index
    %c0_46 = arith.constant 0 : index
    %c0_47 = arith.constant 0 : index
    %140 = vector.load %arg15[%139, %c0_46, %c0_47] : memref<2x1x32xf32, #tpu.memory_space<vmem>>, vector<1x1x32xf32>
    %141 = vector.shape_cast %140 : vector<1x1x32xf32> to vector<1x32xf32>
    %142 = vector.broadcast %141 : vector<1x32xf32> to vector<8x32xf32>
    %143 = arith.mulf %138, %142 : vector<8x32xf32>
    %144 = arith.index_cast %arg1 : i32 to index
    %c0_48 = arith.constant 0 : index
    %c0_49 = arith.constant 0 : index
    %145 = vector.load %arg16[%144, %c0_48, %c0_49] : memref<2x1x32xf32, #tpu.memory_space<vmem>>, vector<1x1x32xf32>
    %146 = vector.shape_cast %145 : vector<1x1x32xf32> to vector<1x32xf32>
    %147 = vector.broadcast %146 : vector<1x32xf32> to vector<8x32xf32>
    %148 = arith.addf %143, %147 : vector<8x32xf32>
    %c0_50 = arith.constant 0 : index
    %c0_51 = arith.constant 0 : index
    %149 = vector.load %arg18[%c0_50, %c0_51] : memref<8x32xf32, #tpu.memory_space<vmem>>, vector<8x32xf32>
    tpu.vector_store %arg18[%c0_50, %c0_51], %148 {strides = array<i32>} : memref<8x32xf32, #tpu.memory_space<vmem>>, vector<8x32xf32>,
    %c1_i32 = arith.constant 1 : i32
    %150 = arith.cmpi eq, %arg1, %c1_i32 : i32
    %151 = arith.extui %150 : i1 to i32
    %c0_i32_52 = arith.constant 0 : i32
    %152 = arith.cmpi ne, %151, %c0_i32_52 : i32
    scf.if %152 {
      %153 = vector.shape_cast %148 : vector<8x32xf32> to vector<1x8x32xf32>
      %c0_53 = arith.constant 0 : index
      %c0_54 = arith.constant 0 : index
      %c0_55 = arith.constant 0 : index
      %154 = vector.load %arg17[%c0_53, %c0_54, %c0_55] : memref<1x8x32xf32, #tpu.memory_space<vmem>>, vector<1x8x32xf32>
      tpu.vector_store %arg17[%c0_53, %c0_54, %c0_55], %153 {strides = array<i32>} : memref<1x8x32xf32, #tpu.memory_space<vmem>>, vector<1x8x32xf32>,
    } else {
    }
    return
  }
  func.func @transform_0(%arg0: i32, %arg1: i32) -> (i32, i32, i32) {
    %c0_i32 = arith.constant 0 : i32
    %c0_i32_0 = arith.constant 0 : i32
    %c0_i32_1 = arith.constant 0 : i32
    return %arg0, %c0_i32, %c0_i32_0 : i32, i32, i32
  }
  func.func @transform_1(%arg0: i32, %arg1: i32) -> (i32, i32, i32) {
    %c0_i32 = arith.constant 0 : i32
    %c0_i32_0 = arith.constant 0 : i32
    %c0_i32_1 = arith.constant 0 : i32
    %c0_i32_2 = arith.constant 0 : i32
    return %c0_i32, %c0_i32_0, %c0_i32_1 : i32, i32, i32
  }
  func.func @transform_2(%arg0: i32, %arg1: i32) -> (i32, i32, i32, i32) {
    %c0_i32 = arith.constant 0 : i32
    %c0_i32_0 = arith.constant 0 : i32
    %c0_i32_1 = arith.constant 0 : i32
    %c0_i32_2 = arith.constant 0 : i32
    return %arg0, %c0_i32, %c0_i32_0, %c0_i32_1 : i32, i32, i32, i32
  }
  func.func @transform_3(%arg0: i32, %arg1: i32) -> (i32, i32, i32) {
    %c0_i32 = arith.constant 0 : i32
    %c0_i32_0 = arith.constant 0 : i32
    %c0_i32_1 = arith.constant 0 : i32
    %c0_i32_2 = arith.constant 0 : i32
    return %c0_i32, %c0_i32_0, %c0_i32_1 : i32, i32, i32
  }
  func.func @transform_4(%arg0: i32, %arg1: i32) -> (i32, i32, i32) {
    %c0_i32 = arith.constant 0 : i32
    %c0_i32_0 = arith.constant 0 : i32
    %c0_i32_1 = arith.constant 0 : i32
    %c0_i32_2 = arith.constant 0 : i32
    return %c0_i32, %c0_i32_0, %c0_i32_1 : i32, i32, i32
  }
  func.func @transform_5(%arg0: i32, %arg1: i32) -> (i32, i32, i32, i32) {
    %c0_i32 = arith.constant 0 : i32
    %c0_i32_0 = arith.constant 0 : i32
    %c0_i32_1 = arith.constant 0 : i32
    %c0_i32_2 = arith.constant 0 : i32
    %c0_i32_3 = arith.constant 0 : i32
    return %c0_i32, %c0_i32_0, %c0_i32_1, %c0_i32_2 : i32, i32, i32, i32
  }
  func.func @transform_6(%arg0: i32, %arg1: i32) -> (i32, i32, i32) {
    %c0_i32 = arith.constant 0 : i32
    %c0_i32_0 = arith.constant 0 : i32
    %c0_i32_1 = arith.constant 0 : i32
    %c0_i32_2 = arith.constant 0 : i32
    return %c0_i32, %c0_i32_0, %c0_i32_1 : i32, i32, i32
  }
  func.func @transform_7(%arg0: i32, %arg1: i32) -> (i32, i32, i32) {
    %c0_i32 = arith.constant 0 : i32
    %c0_i32_0 = arith.constant 0 : i32
    %c0_i32_1 = arith.constant 0 : i32
    %c0_i32_2 = arith.constant 0 : i32
    return %c0_i32, %c0_i32_0, %c0_i32_1 : i32, i32, i32
  }
  func.func @transform_8(%arg0: i32, %arg1: i32) -> (i32, i32, i32) {
    %c0_i32 = arith.constant 0 : i32
    %c0_i32_0 = arith.constant 0 : i32
    %c0_i32_1 = arith.constant 0 : i32
    %c0_i32_2 = arith.constant 0 : i32
    return %c0_i32, %c0_i32_0, %c0_i32_1 : i32, i32, i32
  }
  func.func @transform_9(%arg0: i32, %arg1: i32) -> (i32, i32, i32) {
    %c0_i32 = arith.constant 0 : i32
    %c0_i32_0 = arith.constant 0 : i32
    %c0_i32_1 = arith.constant 0 : i32
    %c0_i32_2 = arith.constant 0 : i32
    return %c0_i32, %c0_i32_0, %c0_i32_1 : i32, i32, i32
  }
  func.func @transform_10(%arg0: i32, %arg1: i32) -> (i32, i32, i32) {
    %c0_i32 = arith.constant 0 : i32
    %c0_i32_0 = arith.constant 0 : i32
    %c0_i32_1 = arith.constant 0 : i32
    %c0_i32_2 = arith.constant 0 : i32
    return %c0_i32, %c0_i32_0, %c0_i32_1 : i32, i32, i32
  }
  func.func @transform_11(%arg0: i32, %arg1: i32) -> (i32, i32, i32) {
    %c0_i32 = arith.constant 0 : i32
    %c0_i32_0 = arith.constant 0 : i32
    %c0_i32_1 = arith.constant 0 : i32
    %c0_i32_2 = arith.constant 0 : i32
    return %c0_i32, %c0_i32_0, %c0_i32_1 : i32, i32, i32
  }
  func.func @transform_12(%arg0: i32, %arg1: i32) -> (i32, i32, i32) {
    %c0_i32 = arith.constant 0 : i32
    %c0_i32_0 = arith.constant 0 : i32
    %c0_i32_1 = arith.constant 0 : i32
    %c0_i32_2 = arith.constant 0 : i32
    return %c0_i32, %c0_i32_0, %c0_i32_1 : i32, i32, i32
  }
  func.func @transform_13(%arg0: i32, %arg1: i32) -> (i32, i32, i32) {
    %c0_i32 = arith.constant 0 : i32
    %c0_i32_0 = arith.constant 0 : i32
    %c0_i32_1 = arith.constant 0 : i32
    %c0_i32_2 = arith.constant 0 : i32
    return %c0_i32, %c0_i32_0, %c0_i32_1 : i32, i32, i32
  }
  func.func @transform_14(%arg0: i32, %arg1: i32) -> (i32, i32, i32) {
    %c0_i32 = arith.constant 0 : i32
    %c0_i32_0 = arith.constant 0 : i32
    %c0_i32_1 = arith.constant 0 : i32
    %c0_i32_2 = arith.constant 0 : i32
    return %c0_i32, %c0_i32_0, %c0_i32_1 : i32, i32, i32
  }
  func.func @transform_15(%arg0: i32, %arg1: i32) -> (i32, i32, i32) {
    %c0_i32 = arith.constant 0 : i32
    %c0_i32_0 = arith.constant 0 : i32
    %c0_i32_1 = arith.constant 0 : i32
    return %arg0, %c0_i32, %c0_i32_0 : i32, i32, i32
  }
}

</mosaic_0001>

<bundles_post_ra>
// kernel: tpu_custom_call.1
= control target key start
LH: loop header
LB: loop body
LE: loop exit
PB: predicated region body
PF: predicated region fallthrough
CT: control target
= control target key end

     0   :  { %s2822_s0 = inlined_call_operand.vmem [shape: f32[2,8,32], index: 0, kind: input, shape index: {}]   ;;  %s2823_s1 = inlined_call_operand.vmem [shape: f32[1,8,32], index: 1, kind: input, shape index: {}]   ;;  %s2824_s2 = inlined_call_operand.vmem [shape: f32[2,1,1,8], index: 2, kind: input, shape index: {}]   ;;  %s2825_s3 = inlined_call_operand.vmem [shape: f32[2,32,96], index: 3, kind: input, shape index: {}]   ;;  %s2826_s4 = inlined_call_operand.vmem [shape: f32[2,1,96], index: 4, kind: input, shape index: {}]   ;;  %s2827_s5 = inlined_call_operand.vmem [shape: f32[2,4,8,32], index: 5, kind: input, shape index: {}]   ;;  %s2828_s6 = inlined_call_operand.vmem [shape: f32[2,1,32], index: 6, kind: input, shape index: {}]   ;;  %s2829_s7 = inlined_call_operand.vmem [shape: f32[2,32,128], index: 7, kind: input, shape index: {}]   ;;  %s2830_s8 = inlined_call_operand.vmem [shape: f32[2,1,128], index: 8, kind: input, shape index: {}]   ;;  %s2831_s9 = inlined_call_operand.vmem [shape: f32[2,128,32], index: 9, kind: input, shape index: {}]   ;;  %s2832_s10 = inlined_call_operand.vmem [shape: f32[2,1,32], index: 10, kind: input, shape index: {}]   ;;  %s2833_s11 = inlined_call_operand.vmem [shape: f32[2,1,32], index: 11, kind: input, shape index: {}]   ;;  %s2834_s12 = inlined_call_operand.vmem [shape: f32[2,1,32], index: 12, kind: input, shape index: {}]   ;;  %s2835_s13 = inlined_call_operand.vmem [shape: f32[2,1,32], index: 13, kind: input, shape index: {}]   ;;  %s2836_s14 = inlined_call_operand.vmem [shape: f32[2,1,32], index: 14, kind: input, shape index: {}]   ;;  %s2837_s15 = inlined_call_operand.hbm [shape: f32[2,8,32], index: 15, kind: output, shape index: {}]  }
   0x1   :  { %2848 = sst [smem:[#allocation15_spill]] %s2822_s0 }
   0x2   :  { %2849 = sst [smem:[#allocation16_spill]] %s2837_s15 }
   0x3   :  { %20 = vsyncpa [#allocation4], 0 }
   0x4   :  { %22 = vsyncpa [#allocation4 + $0x1], 0  ;;  %s2491_s18 = smov 0   ;;  %s2493_s19 = smov 0  }
   0x5   :  { %s2495_s20 = smov 0   ;;  %s2497_s21 = smov 0  }
   0x6   :  { %s2499_s22 = smov 0   ;;  %s2501_s23 = smov 0  }
   0x7   :  { %s2503_s24 = smov 0   ;;  %s2505_s25 = smov 0  }
   0x8 LB: > { %2850 = sst [smem:[#allocation6_spill]] %s2372_s18  ;;  %s1961_s26 = sadd.s32 4294967295, %s2400_s25   ;;  %s2400_s25 = sphi %s2505_s25, %s28_s25   ;;  %s2396_s24 = sphi %s2503_s24, %s2872_s24   ;;  %s2392_s23 = sphi %s2501_s23, %s2871_s23   ;;  %s2388_s22 = sphi %s2499_s22, %s2875_s22   ;;  %s2384_s21 = sphi %s2497_s21, %s2869_s21   ;;  %s2380_s20 = sphi %s2495_s20, %s2868_s20   ;;  %s2376_s19 = sphi %s2493_s19, %s2874_s19   ;;  %s2372_s18 = sphi %s2491_s18, %s2873_s18  }
   0x9   : > { %2851 = sst [smem:[#allocation7_spill]] %s2380_s20  ;;  %s1962_s27 = sadd.s32 4294967294, %s2400_s25  }
   0xa   : > { %2852 = sst [smem:[#allocation8_spill]] %s2392_s23  ;;  %s37_s28 = sadd.s32 1, %s2392_s23 }
   0xb   : > { %2853 = sst [smem:[#allocation9_spill]] %s2396_s24  ;;  %p38_p0 = scmp.ge.s32.totalorder %s37_s28, 2 }
   0xc   : > { %2854 = sst [smem:[#allocation10_spill]] %s2400_s25  ;;  %s40_s29 = sadd.s32 1, %s2396_s24 }
   0xd   : > { %p382_p1 = scmp.ne.s32.totalorder %s2380_s20, %s2376_s19  ;;  %p383_p2 = scmp.eq.s32.totalorder %s1961_s26, 3 }
   0xe   : > { %s2877_s28 = smov (%p38_p0, %s37_s28), 0  ;;  %s2879_s29 = smov (!%p38_p0, %s40_s29), %s2396_s24 }
   0xf   : > { %2855 = sst [smem:[#allocation11_spill]] %s2877_s28  ;;  %p2540_p3 = por %p383_p2, %p382_p1 }
  0x10   : > { %p388_p4 = scmp.ne.s32.totalorder %s2376_s19, %s2372_s18  ;;  %p42_p5 = scmp.ge.s32.totalorder %s2879_s29, 2 }
  0x11   : > { %p389_p6 = scmp.eq.s32.totalorder %s1962_s27, 3  ;;  %p1965_p7 = scmp.ge.s32.totalorder %s2400_s25, 1 }
  0x12   : > { %p459_p8 = scmp.lt.s32.totalorder %s2400_s25, 5  ;;  %s2881_s29 = smov (%p42_p5, %s2879_s29), 0 }
  0x13   : > { %2857 = sst [smem:[#allocation12_spill]] %s2881_s29  ;;  %p2550_p9 = por %p389_p6, %p388_p4 }
  0x14   : > { %p460_p10 = pnand %p1965_p7, %p459_p8  ;;  %s369_s17 = ssub.s32 %s2396_s24, %s2881_s29 }
  0x15   : > { %s2858_s16 = scalar_select %p2550_p9, 1, 0 }
  0x16   : > { %s372_s26 = sadd.s32 1, %s2380_s20  ;;  %p370_p11 = scmp.eq.s32.totalorder %s369_s17, 0 }
  0x17   : > { %2859 = sst [smem:[#allocation13_spill]] %s2858_s16  ;;  %463 = sbr.rel (%p460_p10) target bundleno = 2550 (0x9f6), region = 80 }
  0x18   : > { %s2558_s28 = scalar_select %p370_p11, %s2380_s20, %s372_s26  }
  0x19   : > { %s2846_s27 = sand.u32 (!%p460_p10), 1, %s2376_s19   ;;  %p509_p12 = scmp.lt.s32.totalorder (!%p460_p10), %s2388_s22, 1 }
  0x1a   : > { %2860 = sst [smem:[#allocation14_spill]] %s2558_s28  ;;  %s2564_s23 = sshll.u32 (!%p460_p10), %s2846_s27, 3 }
  0x1b   : > { %s2861_s0 = sld [smem:[#allocation15_spill]] (!%p460_p10)  ;;  %s508_s25 = scalar_lea.vmem (!%p460_p10), [#allocation3], %s2564_s23 }
  0x1c   : > { %p1968_p13 = scmp.ne.s32.totalorder (!%p460_p10), %s2384_s21, 0 }
  0x1e   : > { %s2567_s18 = scalar_select %p509_p12, %s2388_s22, 1 }
  0x1f   : > { %519 = sbr.rel (%p1968_p13) target bundleno = 38 (0x26), region = 84  ;;  %v521_v1 = vld [vmem:[%s2823_s1] sm:$0xff] (!%p1968_p13)  ;;  %vm523_vm0 = vcmask (!%p1968_p13), 261120  }
  0x20   : > { %s1967_s29 = sshll.u32 %s2567_s18, 3  ;;  %s515_s26 = scalar_lea.vmem %s2824_s2, %s2567_s18 }
  0x21   : > { %s512_s16 = scalar_lea.vmem %s2861_s0, %s1967_s29 }
  0x22   : > { %v520_v0 = vld [vmem:[%s512_s16] sm:$0xff] (!%p1968_p13) }
  0x23   : > { %v522_v2 = vadd.f32 (!%p1968_p13), %v521_v1, %v520_v0 }
  0x25   : > { %524 = vst.msk [vmem:[#allocation2] sm:$0xff] (!%p1968_p13), %vm523_vm0, %v522_v2 }
  0x26 PF: > { %s2583_s24 = sshll.u32 %s2384_s21, 5  ;;  %v2402_v3 = vmov 0.0|0.0   ;;  %vm2403_vm1 = vmmov 0   ;;  %v2404_v4 = vmov 0.0   ;;  %vm540_vm2 = vcmask 261120   ;;  %s532_s27 = scalar_lea.vmem %s2826_s4, %s2384_s21 }
  0x27   : > { %2171 = vmatprep.subr.bf16.mxu0 %v2402_v3  ;;  %s527_s29 = scalar_lea.vmem %s2825_s3, %s2583_s24  ;;  %2062 = vmatprep.mubr.msk.f32.mxu0 %vm2403_vm1, %v2404_v4  ;;  %v1970_v12 = vld [vmem:[%s532_s27] ss:$0 sm:$0xff]  ;;  %s2405_s17 = smov 104   ;;  %vm623_vm3 = vcmask 64512  }
  0x28   : > { %v528_v5 = vld [vmem:[%s527_s29] sm:$0xff]  ;;  %v529_v6 = vld [vmem:[%s527_s29 + $0x8] sm:$0xff]  ;;  %v530_v7 = vld [vmem:[%s527_s29 + $0x10] sm:$0xff]  ;;  %2090 = vmatprep.subr.mxu1 %v2404_v4  ;;  %2092 = vmatprep.mubr.msk.f32.mxu1 %vm2403_vm1, %v2404_v4  ;;  %s2406_s20 = smov 120   ;;  %s2407_s28 = smov 96  }
  0x29   : > { %v2172_v8 = vpack.c.bf16 %v529_v6, %v528_v5  ;;  %v531_v9 = vld [vmem:[%s527_s29 + $0x18] sm:$0xff]  ;;  %s2408_s29 = smov 112   ;;  %v1980_v23 = vld [vmem:[%s515_s26] ss:$0 sm:$0xff]  ;;  %s2409_s18 = smov 64  }
  0x2a   : > { %v2175_v10 = vpack.c.bf16 %v531_v9, %v530_v7  ;;  %s1994_s26 = sshll.u32 %s2384_s21, 7  ;;  %s1828_s16 = scalar_lea.vmem %s2835_s13, %s2384_s21 }
  0x2b   : > { %2173 = vmatpush3.bf16.msra.mxu0 %v2172_v8  ;;  %s1837_s27 = scalar_lea.vmem %s2836_s14, %s2384_s21  ;;  %p1998_p0 = scmp.ne.s32.totalorder %s2384_s21, 1 }
  0x2c   : > { %2174 = vmatprep.subr.bf16.mxu0 %v2402_v3  ;;  %v2596_v11 = vld [vmem:[#allocation2] sm:$0xff] }
  0x2f   : > { %2176 = vmatpush3.bf16.msra.mxu0 %v2175_v10 }
  0x30   : > { %2065 = vmatprep.subr.mxu0 %v2404_v4 }
  0x32   : > { %2063 = vmatmul.mubr.msk.f32.vlgmr.msra.gmra.mrb[0].mxu0 %vm540_vm2, %v2596_v11 }
  0x33   : > { %2067 = vmatprep.mubr.msk.f32.mxu0 %vm2403_vm1, %v2404_v4 }
 0x105   : > { %v610_v13 = vpop.f32.mrb[0].mxu0 }
 0x106   : > { %v611_v14 = vadd.f32 %v1970_v12, %v610_v13  ;;  %v2064_v15 = vpop.f32.mrb[1].mxu0 }
 0x108   : > { %619 = vrot.lane.b32.xlu1 %v611_v14, %s2405_s17  ;;  %615 = vrot.lane.b32.xlu0 %v611_v14, %s2406_s20  ;;  %s1285_s17 = scalar_lea.vmem %s2827_s5, %s2583_s24  ;;  %s2710_s20 = scalar_lea.vmem %s2831_s9, %s1994_s26 }
 0x109   : > { %v1286_v13 = vld [vmem:[%s1285_s17] sm:$0xff] }
 0x10c   : > { %621 = vrot.lane.b32.xlu1 %v611_v14, %s2407_s28  ;;  %617 = vrot.lane.b32.xlu0 %v611_v14, %s2408_s29  ;;  %s1589_s29 = scalar_lea.vmem %s2828_s6, %s2384_s21 }
 0x17a   : > { %v2607_v16 = vpop.permute.xlu1 %619  ;;  %v616_v17 = vpop.permute.xlu0 %615 }
 0x17b   : > { %698 = vrot.lane.b32.xlu0 %v616_v17, %s2407_s28 }
 0x17e   : > { %v622_v18 = vpop.permute.xlu1 %621  ;;  %v2609_v19 = vpop.permute.xlu0 %617 }
 0x17f   : > { %2066 = vmatpush3.xpose.msk.msra.mxu0 %vm623_vm3, %v622_v18  ;;  %850 = vrot.lane.b32.xlu0 %v2607_v16, %s2407_s28 }
 0x180   : > { %774 = vrot.lane.b32.xlu1 %v2609_v19, %s2407_s28  ;;  %2070 = vmatprep.subr.mxu0 %v2404_v4 }
 0x182   : > { %2068 = vmatmul.mubr.msk.f32.vlgmr.msra.gmra.mrb[2].mxu0 %vm623_vm3, %v611_v14 }
 0x183   : > { %2072 = vmatprep.mubr.msk.f32.mxu0 %vm2403_vm1, %v2404_v4 }
 0x1ed   : > { %v699_v20 = vpop.permute.xlu0 %698 }
 0x1ee   : > { %2071 = vmatpush3.xpose.msk.msra.mxu0 %vm623_vm3, %v699_v20  ;;  %v1289_v20 = vld [vmem:[%s1285_s17 + $0x18] sm:$0xff] }
 0x1ef   : > { %2075 = vmatprep.subr.mxu0 %v2404_v4 }
 0x1f1   : > { %2073 = vmatmul.mubr.msk.f32.vlgmr.msra.gmra.mrb[4].mxu0 %vm623_vm3, %v616_v17  ;;  %v851_v22 = vpop.permute.xlu0 %850 }
 0x1f2   : > { %v775_v21 = vpop.permute.xlu1 %774  ;;  %2077 = vmatprep.mubr.msk.f32.mxu0 %vm2403_vm1, %v2404_v4 }
 0x1f3   : > { %2076 = vmatpush3.xpose.msk.msra.mxu0 %vm623_vm3, %v775_v21 }
 0x1f4   : > { %2080 = vmatprep.subr.mxu0 %v2404_v4 }
 0x1f6   : > { %2078 = vmatmul.mubr.msk.f32.vlgmr.msra.gmra.mrb[6].mxu0 %vm623_vm3, %v2609_v19 }
 0x1f7   : > { %2081 = vmatpush3.xpose.msk.msra.mxu0 %vm623_vm3, %v851_v22  ;;  %2082 = vmatprep.mubr.msk.f32.mxu0 %vm2403_vm1, %v2404_v4 }
 0x1f8   : > { %2085 = vmatprep.subr.mxu0 %v2404_v4 }
 0x1fa   : > { %2083 = vmatmul.mubr.msk.f32.vlgmr.msra.gmra.mrb[8].mxu0 %vm623_vm3, %v2607_v16 }
 0x1fb   : > { %2087 = vmatprep.mubr.msk.f32.mxu0 %vm2403_vm1, %v2404_v4 }
 0x255   : > { %v694_v24 = vpop.f32.mrb[2].mxu0 }
 0x256   : > { %v933_v25 = vadd.f32 %v1980_v23, %v694_v24  ;;  %v2069_v26 = vpop.f32.mrb[3].mxu0 }
 0x258   : > { %v937_v27 = vsel %vm623_vm3, %v933_v25, -inf }
 0x259   : > { %938 = vmax.xlane.f32.xlu1 %v937_v27 }
 0x2c4   : > { %v770_v28 = vpop.f32.mrb[4].mxu0 }
 0x2c5   : > { %v934_v29 = vadd.f32 %v1980_v23, %v770_v28  ;;  %v2074_v30 = vpop.f32.mrb[5].mxu0 }
 0x2c7   : > { %v940_v31 = vsel %vm623_vm3, %v934_v29, -inf }
 0x2c8   : > { %941 = vmax.xlane.f32.xlu0 %v940_v31 }
 0x2c9   : > { %v846_v32 = vpop.f32.mrb[6].mxu0 }
 0x2ca   : > { %v935_v33 = vadd.f32 %v1980_v23, %v846_v32  ;;  %v2079_v34 = vpop.f32.mrb[7].mxu0 }
 0x2cc   : > { %v943_v35 = vsel %vm623_vm3, %v935_v33, -inf }
 0x2cd   : > { %944 = vmax.xlane.f32.xlu0 %v943_v35  ;;  %v922_v36 = vpop.f32.mrb[8].mxu0 }
 0x2ce   : > { %v936_v37 = vadd.f32 %v1980_v23, %v922_v36  ;;  %v2084_v38 = vpop.f32.mrb[9].mxu0 }
 0x2d0   : > { %v946_v39 = vsel %vm623_vm3, %v936_v37, -inf }
 0x2d1   : > { %947 = vmax.xlane.f32.xlu1 %v946_v39  ;;  %v1989_v39 = vld [vmem:[%s1589_s29] ss:$0 sm:$0xff]  ;;  %s1613_s29 = scalar_lea.vmem %s2833_s11, %s2384_s21 }
 0x2e2   : > { %1057 = vrot.lane.b32.xlu1 %v616_v17, %s2409_s18  ;;  %v1288_v17 = vld [vmem:[%s1285_s17 + $0x10] sm:$0xff] }
 0x2e3   : > { %981 = vrot.lane.b32.xlu0 %v611_v14, %s2409_s18 }
 0x2e6   : > { %v939_v40 = vpop.xlane.xlu1 %938 }
 0x2e7   : > { %v949_v41 = vsub.f32 %v933_v25, %v939_v40 }
 0x2e9   : > { %v953_v42 = vmul.f32 1.442695, %v949_v41 }
 0x2eb   : > { %2286 = vpow2.f32 %v953_v42 }
 0x2f5   : > { %v2287_v43 = vpop.eup %2286 }
 0x2f6   : > { %v961_v44 = vsel %vm623_vm3, %v2287_v43, 0.0 }
 0x302   : > { %962 = vadd.xlane.f32.xlu0 %v961_v44 }
 0x355   : > { %v942_v45 = vpop.xlane.xlu0 %941 }
 0x356   : > { %v950_v46 = vsub.f32 %v934_v29, %v942_v45 }
 0x358   : > { %v955_v47 = vmul.f32 1.442695, %v950_v46 }
 0x35a   : > { %2288 = vpow2.f32 %v955_v47  ;;  %v945_v48 = vpop.xlane.xlu0 %944 }
 0x35b   : > { %v951_v49 = vsub.f32 %v935_v33, %v945_v48 }
 0x35d   : > { %v957_v50 = vmul.f32 1.442695, %v951_v49 }
 0x35e   : > { %v982_v51 = vpop.permute.xlu0 %981  ;;  %v948_v52 = vpop.xlane.xlu1 %947 }
 0x35f   : > { %2290 = vpow2.f32 %v957_v50  ;;  %v952_v53 = vsub.f32 %v936_v37, %v948_v52  ;;  %2086 = vmatpush3.msra.mxu0 %v982_v51 }
 0x360   : > { %2095 = vmatprep.subr.mxu0 %v2404_v4 }
 0x361   : > { %v959_v54 = vmul.f32 1.442695, %v952_v53 }
 0x362   : > { %v1058_v55 = vpop.permute.xlu1 %1057 }
 0x363   : > { %2292 = vpow2.f32 %v959_v54  ;;  %2091 = vmatpush3.msra.mxu1 %v1058_v55  ;;  %v1720_v55 = vld [vmem:[%s2710_s20] sm:$0xff] }
 0x364   : > { %v2289_v56 = vpop.eup %2288  ;;  %2100 = vmatprep.subr.mxu1 %v2404_v4 }
 0x365   : > { %v964_v57 = vsel %vm623_vm3, %v2289_v56, 0.0 }
 0x366   : > { %965 = vadd.xlane.f32.xlu1 %v964_v57  ;;  %v1722_v57 = vld [vmem:[%s2710_s20 + $0x10] sm:$0xff] }
 0x369   : > { %v2291_v58 = vpop.eup %2290 }
 0x36a   : > { %v967_v59 = vsel %vm623_vm3, %v2291_v58, 0.0 }
 0x36b   : > { %968 = vadd.xlane.f32.xlu0 %v967_v59  ;;  %v1723_v59 = vld [vmem:[%s2710_s20 + $0x18] sm:$0xff] }
 0x36d   : > { %v2293_v60 = vpop.eup %2292 }
 0x36e   : > { %v970_v61 = vsel %vm623_vm3, %v2293_v60, 0.0 }
 0x36f   : > { %971 = vadd.xlane.f32.xlu1 %v970_v61  ;;  %v1724_v61 = vld [vmem:[%s2710_s20 + $0x20] sm:$0xff] }
 0x380   : > { %1133 = vrot.lane.b32.xlu1 %v2609_v19, %s2409_s18 }
 0x381   : > { %1209 = vrot.lane.b32.xlu0 %v2607_v16, %s2409_s18  ;;  %v1287_v16 = vld [vmem:[%s1285_s17 + $0x8] sm:$0xff]  ;;  %s1631_s18 = scalar_lea.vmem %s2829_s7, %s2583_s24  ;;  %s1636_s17 = scalar_lea.vmem %s2830_s8, %s2384_s21 }
 0x382   : > { %v1632_v50 = vld [vmem:[%s1631_s18] sm:$0xff]  ;;  %v1633_v51 = vld [vmem:[%s1631_s18 + $0x8] sm:$0xff]  ;;  %v1635_v53 = vld [vmem:[%s1631_s18 + $0x18] sm:$0xff] }
 0x383   : > { %v2178_v52 = vpack.c.bf16 %v1633_v51, %v1632_v50 }
 0x38f   : > { %v963_v62 = vpop.xlane.xlu0 %962 }
 0x390   : > { %2294 = vrcp.f32 %v963_v62  ;;  %v1725_v62 = vld [vmem:[%s2710_s20 + $0x28] sm:$0xff] }
 0x39a   : > { %v2295_v63 = vpop.eup %2294 }
 0x39b   : > { %v977_v0 = vmul.f32 %v2295_v63, %v2287_v43  ;;  %v2190_v63 = vpack.c.bf16 %v1725_v62, %v1724_v61 }
 0x39d   : > { %2088 = vmatmul.mubr.msk.f32.vlgmr.msra.gmra.mrb[10].mxu0 %vm623_vm3, %v977_v0  ;;  %v1726_v0 = vld [vmem:[%s2710_s20 + $0x30] sm:$0xff] }
 0x39e   : > { %2097 = vmatprep.mubr.msk.f32.mxu0 %vm2403_vm1, %v2404_v4 }
 0x3f3   : > { %v966_v1 = vpop.xlane.xlu1 %965 }
 0x3f4   : > { %2296 = vrcp.f32 %v966_v1  ;;  %v1727_v1 = vld [vmem:[%s2710_s20 + $0x38] sm:$0xff] }
 0x3f8   : > { %v969_v2 = vpop.xlane.xlu0 %968 }
 0x3f9   : > { %2298 = vrcp.f32 %v969_v2  ;;  %v2193_v2 = vpack.c.bf16 %v1727_v1, %v1726_v0 }
 0x3fc   : > { %v972_v5 = vpop.xlane.xlu1 %971  ;;  %v1210_v9 = vpop.permute.xlu0 %1209 }
 0x3fd   : > { %2300 = vrcp.f32 %v972_v5  ;;  %v1728_v5 = vld [vmem:[%s2710_s20 + $0x40] sm:$0xff] }
 0x3fe   : > { %v2297_v6 = vpop.eup %2296 }
 0x3ff   : > { %v978_v7 = vmul.f32 %v2297_v6, %v2289_v56  ;;  %v1721_v56 = vld [vmem:[%s2710_s20 + $0x8] sm:$0xff] }
 0x400   : > { %v1134_v8 = vpop.permute.xlu1 %1133  ;;  %v1729_v6 = vld [vmem:[%s2710_s20 + $0x48] sm:$0xff] }
 0x401   : > { %2096 = vmatpush3.msra.mxu0 %v1134_v8  ;;  %2093 = vmatmul.mubr.msk.f32.vlgmr.msra.gmra.mrb[0].mxu1 %vm623_vm3, %v978_v7  ;;  %v2196_v7 = vpack.c.bf16 %v1729_v6, %v1728_v5  ;;  %v1730_v8 = vld [vmem:[%s2710_s20 + $0x50] sm:$0xff] }
 0x402   : > { %2101 = vmatpush3.msra.mxu1 %v1210_v9  ;;  %2102 = vmatprep.mubr.msk.f32.mxu1 %vm2403_vm1, %v2404_v4  ;;  %v1731_v9 = vld [vmem:[%s2710_s20 + $0x58] sm:$0xff] }
 0x403   : > { %v2299_v10 = vpop.eup %2298  ;;  %2105 = vmatprep.subr.mxu0 %v2404_v4  ;;  %2110 = vmatprep.subr.mxu1 %v2404_v4 }
 0x404   : > { %v979_v12 = vmul.f32 %v2299_v10, %v2291_v58  ;;  %v2184_v58 = vpack.c.bf16 %v1721_v56, %v1720_v55  ;;  %v2199_v10 = vpack.c.bf16 %v1731_v9, %v1730_v8 }
 0x406   : > { %2098 = vmatmul.mubr.msk.f32.vlgmr.msra.gmra.mrb[12].mxu0 %vm623_vm3, %v979_v12  ;;  %v1732_v12 = vld [vmem:[%s2710_s20 + $0x60] sm:$0xff] }
 0x407   : > { %v2301_v14 = vpop.eup %2300  ;;  %2106 = vmatpush3.msra.mxu0 %v1286_v13  ;;  %2107 = vmatprep.mubr.msk.f32.mxu0 %vm2403_vm1, %v2404_v4  ;;  %v1733_v13 = vld [vmem:[%s2710_s20 + $0x68] sm:$0xff] }
 0x408   : > { %v980_v15 = vmul.f32 %v2301_v14, %v2293_v60  ;;  %2115 = vmatprep.subr.mxu0 %v2404_v4  ;;  %v2187_v60 = vpack.c.bf16 %v1723_v59, %v1722_v57  ;;  %v2202_v14 = vpack.c.bf16 %v1733_v13, %v1732_v12 }
 0x40a   : > { %2103 = vmatmul.mubr.msk.f32.vlgmr.msra.gmra.mrb[2].mxu1 %vm623_vm3, %v980_v15 }
 0x40b   : > { %2112 = vmatprep.mubr.msk.f32.mxu1 %vm2403_vm1, %v2404_v4  ;;  %2111 = vmatpush3.msra.mxu1 %v1287_v16 }
 0x40c   : > { %2120 = vmatprep.subr.mxu1 %v2404_v4 }
 0x470   : > { %v1053_v18 = vpop.f32.mrb[10].mxu0 }
 0x471   : > { %v2089_v19 = vpop.f32.mrb[11].mxu0  ;;  %2108 = vmatmul.mubr.msk.f32.vlgmr.msra.gmra.mrb[14].mxu0 %vm623_vm3, %v1053_v18 }
 0x472   : > { %2116 = vmatpush3.msra.mxu0 %v1288_v17  ;;  %2117 = vmatprep.mubr.msk.f32.mxu0 %vm2403_vm1, %v2404_v4  ;;  %v1990_v19 = vld [vmem:[%s1613_s29] ss:$0 sm:$0xff]  ;;  %s1736_s29 = scalar_lea.vmem %s2832_s10, %s2384_s21 }
 0x473   : > { %2177 = vmatprep.subr.bf16.mxu0 %v2402_v3 }
 0x4d4   : > { %v1129_v21 = vpop.f32.mrb[0].mxu1 }
 0x4d5   : > { %v2094_v22 = vpop.f32.mrb[1].mxu1  ;;  %2113 = vmatmul.mubr.msk.f32.vlgmr.msra.gmra.mrb[4].mxu1 %vm623_vm3, %v1129_v21 }
 0x4d6   : > { %2121 = vmatpush3.msra.mxu1 %v1289_v20  ;;  %2122 = vmatprep.mubr.msk.f32.mxu1 %vm2403_vm1, %v2404_v4 }
 0x4d7   : > { %2183 = vmatprep.subr.bf16.mxu1 %v2402_v3 }
 0x4d9   : > { %v1205_v23 = vpop.f32.mrb[12].mxu0 }
 0x4da   : > { %v2099_v24 = vpop.f32.mrb[13].mxu0  ;;  %2118 = vmatmul.mubr.msk.f32.vlgmr.msra.gmra.mrb[16].mxu0 %vm623_vm3, %v1205_v23  ;;  %v1734_v23 = vld [vmem:[%s2710_s20 + $0x70] sm:$0xff] }
 0x4db   : > { %2133 = vmatprep.mubr.msk.f32.mxu0 %vm2403_vm1, %v2404_v4  ;;  %2179 = vmatpush3.bf16.msra.mxu0 %v2178_v52  ;;  %v1735_v24 = vld [vmem:[%s2710_s20 + $0x78] sm:$0xff] }
 0x4dc   : > { %2180 = vmatprep.subr.bf16.mxu0 %v2402_v3 }
 0x4dd   : > { %v1281_v25 = vpop.f32.mrb[2].mxu1 }
 0x4de   : > { %v2104_v26 = vpop.f32.mrb[3].mxu1  ;;  %2123 = vmatmul.mubr.msk.f32.vlgmr.msra.gmra.mrb[6].mxu1 %vm623_vm3, %v1281_v25  ;;  %v2205_v25 = vpack.c.bf16 %v1735_v24, %v1734_v23 }
 0x4df   : > { %2168 = vmatprep.mubr.msk.f32.mxu1 %vm2403_vm1, %v2404_v4  ;;  %2185 = vmatpush3.bf16.msra.mxu1 %v2184_v58  ;;  %v1992_v26 = vld [vmem:[%s1636_s17] ss:$0 sm:$0xff] }
 0x4e0   : > { %2186 = vmatprep.subr.bf16.mxu1 %v2402_v3 }
 0x4e3   : > { %2188 = vmatpush3.bf16.msra.mxu1 %v2187_v60 }
 0x4e4   : > { %2189 = vmatprep.subr.bf16.mxu1 %v2402_v3 }
 0x4e7   : > { %2191 = vmatpush3.bf16.msra.mxu1 %v2190_v63 }
 0x4e8   : > { %2192 = vmatprep.subr.bf16.mxu1 %v2402_v3 }
 0x4eb   : > { %2194 = vmatpush3.bf16.msra.mxu1 %v2193_v2 }
 0x4ec   : > { %2195 = vmatprep.subr.bf16.mxu1 %v2402_v3 }
 0x4ef   : > { %2197 = vmatpush3.bf16.msra.mxu1 %v2196_v7 }
 0x4f0   : > { %2198 = vmatprep.subr.bf16.mxu1 %v2402_v3 }
 0x4f3   : > { %2200 = vmatpush3.bf16.msra.mxu1 %v2199_v10 }
 0x4f4   : > { %2201 = vmatprep.subr.bf16.mxu1 %v2402_v3 }
 0x4f7   : > { %2203 = vmatpush3.bf16.msra.mxu1 %v2202_v14 }
 0x4f8   : > { %2204 = vmatprep.subr.bf16.mxu1 %v2402_v3 }
 0x4fb   : > { %2206 = vmatpush3.bf16.msra.mxu1 %v2205_v25 }
 0x544   : > { %v1359_v27 = vpop.f32.mrb[14].mxu0 }
 0x545   : > { %v2109_v28 = vpop.f32.mrb[15].mxu0  ;;  %v1582_v30 = vsel %vm540_vm2, %v1359_v27, 0.0 }
 0x5a8   : > { %v1432_v29 = vpop.f32.mrb[4].mxu1 }
 0x5a9   : > { %v1583_v31 = vsel %vm540_vm2, %v1432_v29, 0.0  ;;  %v2114_v32 = vpop.f32.mrb[5].mxu1 }
 0x5aa   : > { %v1584_v33 = vadd.f32 %v1583_v31, %v1582_v30  ;;  %v1995_v31 = vld [vmem:[%s1736_s29] ss:$0 sm:$0xff] }
 0x5ad   : > { %v1505_v34 = vpop.f32.mrb[16].mxu0 }
 0x5ae   : > { %v1585_v35 = vsel %vm540_vm2, %v1505_v34, 0.0  ;;  %v2119_v36 = vpop.f32.mrb[17].mxu0 }
 0x5af   : > { %v1586_v37 = vadd.f32 %v1585_v35, %v1584_v33 }
 0x5b1   : > { %v1578_v4 = vpop.f32.mrb[6].mxu1 }
 0x5b2   : > { %v1587_v38 = vsel %vm540_vm2, %v1578_v4, 0.0  ;;  %v2124_v40 = vpop.f32.mrb[7].mxu1 }
 0x5b3   : > { %v1588_v41 = vadd.f32 %v1587_v38, %v1586_v37 }
 0x5b5   : > { %v1597_v42 = vadd.f32 %v1989_v39, %v1588_v41 }
 0x5b7   : > { %v1598_v43 = vadd.f32 %v1597_v42, %v2596_v11  ;;  %v1634_v11 = vld [vmem:[%s1631_s18 + $0x10] sm:$0xff]  ;;  %s1622_s18 = scalar_lea.vmem %s2834_s12, %s2384_s21 }
 0x5b8   : > { %v2181_v54 = vpack.c.bf16 %v1635_v53, %v1634_v11  ;;  %v1991_v21 = vld [vmem:[%s1622_s18] ss:$0 sm:$0xff] }
 0x5b9   : > { %v1599_v44 = vsel %vm540_vm2, %v1598_v43, 0.0 }
 0x5ba   : > { %1600 = vadd.xlane.f32.xlu1 %v1599_v44  ;;  %2182 = vmatpush3.bf16.msra.mxu0 %v2181_v54 }
 0x647   : > { %v1601_v45 = vpop.xlane.xlu1 %1600 }
 0x648   : > { %v1603_v46 = vmul.f32 0.03125, %v1601_v45  ;;  %v1996_v45 = vld [vmem:[%s1828_s16] ss:$0 sm:$0xff] }
 0x64a   : > { %v1604_v47 = vsub.f32 %v1598_v43, %v1603_v46 }
 0x64c   : > { %v1605_v48 = vmul.f32 %v1604_v47, %v1604_v47 }
 0x64e   : > { %v1606_v49 = vsel %vm540_vm2, %v1605_v48, 0.0 }
 0x64f   : > { %1607 = vadd.xlane.f32.xlu0 %v1606_v49 }
 0x6dc   : > { %v1608_v15 = vpop.xlane.xlu0 %1607 }
 0x6dd   : > { %v1609_v16 = vmul.f32 0.03125, %v1608_v15 }
 0x6df   : > { %v1610_v17 = vadd.f32 1e-05, %v1609_v16 }
 0x6e1   : > { %2302 = vrsqrt.f32 %v1610_v17 }
 0x6eb   : > { %v2303_v18 = vpop.eup %2302 }
 0x6ec   : > { %v1612_v20 = vmul.f32 %v2303_v18, %v1604_v47  ;;  %v1997_v47 = vld [vmem:[%s1837_s27] ss:$0 sm:$0xff] }
 0x6ee   : > { %v1621_v22 = vmul.f32 %v1990_v19, %v1612_v20 }
 0x6f0   : > { %v1630_v3 = vadd.f32 %v1991_v21, %v1621_v22 }
 0x6f2   : > { %2134 = vmatmul.mubr.msk.f32.vlgmr.msra.gmra.mrb[18].mxu0 %vm540_vm2, %v1630_v3 }
 0x7c5   : > { %v1713_v27 = vpop.f32.mrb[18].mxu0 }
 0x7c6   : > { %v1714_v28 = vadd.f32 %v1992_v26, %v1713_v27  ;;  %v2135_v29 = vpop.f32.mrb[19].mxu0 }
 0x7c8   : > { %v1717_v30 = vmax.f32 %v1714_v28, 0.0 }
 0x7ca   : > { %2169 = vmatmul.mubr.f32.vlgmr.msra.gmra.mrb[8].mxu1 %v1717_v30 }
 0x89d   : > { %v1810_v32 = vpop.f32.mrb[8].mxu1 }
 0x89e   : > { %v1811_v33 = vadd.f32 %v1995_v31, %v1810_v32  ;;  %v2170_v34 = vpop.f32.mrb[9].mxu1 }
 0x8a0   : > { %v1814_v35 = vadd.f32 %v1811_v33, %v1630_v3 }
 0x8a2   : > { %v1815_v36 = vsel %vm540_vm2, %v1814_v35, 0.0 }
 0x8a3   : > { %1816 = vadd.xlane.f32.xlu0 %v1815_v36 }
 0x930   : > { %v1817_v37 = vpop.xlane.xlu0 %1816 }
 0x931   : > { %v1818_v4 = vmul.f32 0.03125, %v1817_v37 }
 0x933   : > { %v1819_v38 = vsub.f32 %v1814_v35, %v1818_v4 }
 0x935   : > { %v1820_v39 = vmul.f32 %v1819_v38, %v1819_v38 }
 0x937   : > { %v1821_v40 = vsel %vm540_vm2, %v1820_v39, 0.0 }
 0x938   : > { %1822 = vadd.xlane.f32.xlu1 %v1821_v40 }
 0x9c5   : > { %v1823_v41 = vpop.xlane.xlu1 %1822 }
 0x9c6   : > { %v1824_v42 = vmul.f32 0.03125, %v1823_v41 }
 0x9c8   : > { %v1825_v43 = vadd.f32 1e-05, %v1824_v42 }
 0x9ca   : > { %2304 = vrsqrt.f32 %v1825_v43 }
 0x9d4   : > { %v2305_v44 = vpop.eup %2304 }
 0x9d5   : > { %v1827_v46 = vmul.f32 %v2305_v44, %v1819_v38  ;;  %1850 = sbr.rel (%p1998_p0) target bundleno = 2524 (0x9dc), region = 88 }
 0x9d7   : > { %v1836_v48 = vmul.f32 %v1996_v45, %v1827_v46 }
 0x9d9   : > { %v1845_v49 = vadd.f32 %v1997_v47, %v1836_v48 }
 0x9db   : > { %1846 = vst.msk [vmem:[#allocation2] sm:$0xff] %vm540_vm2, %v1845_v49  ;;  %1851 = vst.msk [vmem:[%s508_s25] sm:$0xff] (!%p1998_p0), %vm540_vm2, %v1845_v49 }
 0x9dc PF: > { %s2000_s17 = sshll.u32 %s2388_s22, 7  ;;  %s2862_s29 = sld [smem:[#allocation16_spill]] }
 0x9dd   : > { %s1866_s15 = sshll.u32 %s508_s25, 4  ;;  %s2863_s21 = sand.u32 1, %s2376_s19   ;;  %s1867_s15 = int_to_ptr.vmem [resolvable:$true] %s1866_s15 }
 0x9de   : > { %s1853_s16 = scalar_lea.sflag [#allocation4], %s2863_s21  ;;  %s2306_s18 = scalar_lea.vmem %s1867_s15, 128 }
 0x9df   : > { %p2307_p1 = scmp.ne.s32.totalorder %s1867_s15, %s2306_s18  ;;  %s2410_s26 = smov [#allocation3]  }
 0x9e0   : > { %s2310_s27 = sshll.u32 %s2410_s26, 4  ;;  %s2311_s27 = int_to_ptr.vmem [resolvable:$false] %s2310_s27 }
 0x9e1   : > { %p2308_p2 = pnand %p2307_p1, %p2540_p3  ;;  %s2312_s0 = scalar_lea.vmem %s2311_s27, 256 }
 0x9e2   : > { %s2771_s20 = scalar_lea.hbm %s2862_s29, %s2000_s17  ;;  %p2313_p5 = scmp.lt.s32.totalorder %s1867_s15, %s2311_s27 }
 0x9e3   : > { %p2309_p4 = pneg %p2308_p2  ;;  %p2314_p6 = scmp.lt.s32.totalorder %s2312_s0, %s2306_s18 }
 0x9e5   : > { %p2315_p7 = por %p2314_p6, %p2313_p5 }
 0x9e7   : > { %p2316_p8 = pnand %p2315_p7, %p2309_p4 }
 0x9e9   : > { %2319 = shalt.err (!%p2316_p8)
}
 0x9ea   : > { %s2320_s22 = scalar_lea.hbm %s2771_s20, 128  ;;  %s2324_s17 = scalar_lea.hbm %s2862_s29, 256 }
 0x9eb   : > { %p2321_p10 = scmp.ne.s32.totalorder %s2771_s20, %s2320_s22  ;;  %p2325_p13 = scmp.lt.u32.totalorder %s2771_s20, %s2862_s29 }
 0x9ec   : > { %p2326_p0 = scmp.lt.u32.totalorder %s2324_s17, %s2320_s22  ;;  %p2328_p2 = scmp.lt.u32.totalorder %s2320_s22, %s2771_s20 }
 0x9ed   : > { %p2322_p11 = pnand %p2321_p10, %p2540_p3 }
 0x9ee   : > { %p2327_p1 = por %p2326_p0, %p2325_p13 }
 0x9ef   : > { %p2323_p12 = pneg %p2322_p11 }
 0x9f0   : > { %p2329_p4 = por %p2328_p2, %p2327_p1 }
 0x9f2   : > { %p2330_p5 = pnand %p2329_p4, %p2323_p12 }
 0x9f4   : > { %2333 = shalt.err (!%p2330_p5)
}
 0x9f5   : > { %2207 = dma.vmem_to_hbm [thread:$0]  (%p2540_p3), %s1867_s15, 128, %s2771_s20, %s1853_s16  }
 0x9f6 PF: > { %s2864_s0 = sld [smem:[#allocation10_spill]]  ;;  %s2865_s21 = sld [smem:[#allocation6_spill]] }
 0x9fc   : > { %p2213_p6 = scmp.ge.s32.totalorder %s2864_s0, 2  ;;  %s1878_s26 = sand.u32 1, %s2865_s21  }
 0x9fd   : > { %s1879_s27 = scalar_lea.sflag [#allocation4], %s1878_s26 }
 0x9fe   : > { %p2210_p7 = pnand %p2213_p6, %p2550_p9 }
 0xa00   : > { %2367 = dma.done.wait (!%p2210_p7), %s1879_s27, 128  }
 0xa01   : > { %2369 = vsyncadd (!%p2210_p7), %s1879_s27, 4294967168  ;;  %s28_s25 = sadd.s32 1, %s2864_s0   ;;  %s2867_s22 = sld [smem:[#allocation7_spill]] }
 0xa02   : > { %p25_p8 = scmp.ge.s32.totalorder %s28_s25, 6   ;;  %s2868_s20 = sld [smem:[#allocation14_spill]] }
 0xa03   : > { %s2869_s21 = sld [smem:[#allocation8_spill]]  ;;  %s2870_s30 = sld [smem:[#allocation9_spill]] }
 0xa04   : > { %s2871_s23 = sld [smem:[#allocation11_spill]]  ;;  %s2872_s24 = sld [smem:[#allocation12_spill]] }
 0xa05   : > { %s2873_s18 = smov %s2376_s19  ;;  %27 = sbr.rel (!%p25_p8) target bundleno = 8 (0x8), region = 138 }
 0xa07   : > { %s2874_s19 = smov %s2867_s22 }
 0xa09   : > { %s2875_s22 = smov %s2870_s30 }
 0xa0c   :  { %1884 = vsyncpa [#allocation4], 1 }
 0xa0d   :  { %1886 = vsyncpa [#allocation4 + $0x1], 1 }

</bundles_post_ra>
